<compile_context>
chip_gen: v6e
topology: v6e:2x2x1
jax: 0.10.0
libtpu: 0.0.40
codegen_flags: <defaults>
</compile_context>

<pallas_src>
from functools import partial
from math import sqrt

import jax
import jax.numpy as jnp
from jax.experimental import pallas as pl
from jax.experimental.pallas import tpu as pltpu

_LANE_Q = 128                                   # lane quantum
_LANE_CANDIDATES = (8192, 4096, 2048, 1024, 512, 256, 128)
_TINY_BYPASS_BYTES = 1 << 20                    # total (x + res + out) HBM bytes
_TARGET_TILE_BYTES = 4 * 1024 * 1024            # per-block budget (f32-equivalent)
_VMEM_LIMIT_BYTES = 48 * 1024 * 1024            # > v5e's 16 MiB default scoped
                                                # VMEM, < v7x's 64 MiB physical


def _sublane_tile(dtype) -> int:
    """Native sublane tile: 8 for 32-bit, 16 for 16-bit, 32 for 8-bit dtypes."""
    return max(8, (8 * 4) // jnp.dtype(dtype).itemsize)


def _num_tensorcores() -> int:
    """2 for megacore-style chips (v7x / v5p / v4), 1 for v5e / v6e."""
    try:
        kind = jax.devices()[0].device_kind.lower()
    except Exception:       # no device visible (e.g. interpret mode)
        return 1
    return 2 if any(tag in kind for tag in ("v7", "7x", "v5p", "v4")) else 1


def _mp_add_kernel(x_ref, res_ref, o_ref, *, cx, cr):
    # Mem-bound: the f32 casts + 2 muls + 1 add all ride in VALU slack.
    x = x_ref[...].astype(jnp.float32)
    r = res_ref[...].astype(jnp.float32)
    o_ref[...] = (x * cx + r * cr).astype(o_ref.dtype)


def _as_2d_view(x):
    """Free (bitcast) reshape of x into a lane-dense 2-D slab (rows, lanes).

    * n % 128 == 0: widest candidate W dividing n exactly -> full lane density.
    * otherwise: row-major collapse of trailing dims until lanes >= 1024, then
      blocks use the full lane extent -> near-full density, still zero copies.
    """
    n = x.size
    if n % _LANE_Q == 0:
        W = next(c for c in _LANE_CANDIDATES if n % c == 0)
        return x.reshape(n // W, W)
    lanes = 1
    for d in reversed(x.shape):
        lanes *= int(d)
        if lanes >= 1024:
            break
    # TODO(synk): a huge 1-D awkward tensor collapses to a single (1, n) row
    # (8x sublane waste); rare enough for MPAdd feature maps to not special-case.
    return x.reshape(n // lanes, lanes)


def _choose_block(R, C, dtype, target_tile_bytes, num_tc):
    """Pick (tile_rows, tile_lanes) for the (R, C) slab."""
    itemsize = jnp.dtype(dtype).itemsize
    sub = _sublane_tile(dtype)
    # Budget in f32-equivalent elements: bounds both the pipeline buffers and
    # the in-kernel f32 temporaries for sub-32-bit inputs.
    elems = max(sub * _LANE_Q, target_tile_bytes // max(4, itemsize))

    min_rows = min(R, sub)
    if C * min_rows <= elems:
        tile_lanes = C                                  # full rows: always legal
    else:
        # Enormous rows: tile the lane dim with a big multiple of 128; the
        # partial trailing lane block is handled by Pallas with masked stores.
        tile_lanes = max(_LANE_Q, (elems // min_rows) // _LANE_Q * _LANE_Q)

    rows_budget = max(1, elems // tile_lanes)
    if R <= sub:
        tile_rows = R                                   # full extent (legal)
    else:
        tile_rows = max(sub, (rows_budget // sub) * sub)
        tile_rows = min(tile_rows, R)                   # == R -> full extent

    # Forced split only where two TensorCores can actually use it (v7x-class).
    if num_tc >= 2 and pl.cdiv(C, tile_lanes) == 1 and R > sub:
        g_rows = pl.cdiv(R, tile_rows)
        n_row_tiles = pl.cdiv(R, sub)
        if g_rows == 1 and n_row_tiles >= 2:
            # Whole slab fit one block: split into two halves that differ by at
            # most one native sublane tile so neither core idles.
            tile_rows = pl.cdiv(n_row_tiles, 2) * sub
        elif g_rows % 2 == 1:
            # Prefer an even number of row blocks for the 2-way core split;
            # shrinking tile_rows only reduces VMEM use.
            cand = pl.cdiv(pl.cdiv(R, g_rows + 1), sub) * sub
            if sub <= cand < tile_rows:
                tile_rows = cand
    return tile_rows, tile_lanes


def mp_add(x, res, t, *, target_tile_bytes=_TARGET_TILE_BYTES):
    """Magnitude-preserving add: (x*(1-t) + res*t) / sqrt((1-t)^2 + t^2).

    `t` must be a static Python/number constant (the PyTorch module stores it
    at __init__); a traced `t` raises loudly at float(t).
    """
    assert x.shape == res.shape, (x.shape, res.shape)
    assert x.dtype == res.dtype, (x.dtype, res.dtype)

    t = float(t)                      # ConcretizationTypeError if t is traced
    den = sqrt((1.0 - t) ** 2 + t ** 2)
    cx = (1.0 - t) / den
    cr = t / den

    orig_shape = x.shape
    n = x.size
    itemsize = jnp.dtype(x.dtype).itemsize

    # ---- tiny-input bypass: launch/grid cost dominates; XLA fuses this. ----
    if n == 0 or 3 * n * itemsize < _TINY_BYPASS_BYTES:
        out = x.astype(jnp.float32) * cx + res.astype(jnp.float32) * cr
        return out.astype(x.dtype)

    # ---- free 2-D view + tiling (no pad / slice / concat anywhere) ---------
    x2 = _as_2d_view(x)
    r2 = _as_2d_view(res)
    R, C = x2.shape
    tile_rows, tile_lanes = _choose_block(
        R, C, x.dtype, target_tile_bytes, _num_tensorcores())
    grid = (pl.cdiv(R, tile_rows), pl.cdiv(C, tile_lanes))

    spec = pl.BlockSpec((tile_rows, tile_lanes), lambda i, j: (i, j))
    out = pl.pallas_call(
        partial(_mp_add_kernel, cx=cx, cr=cr),
        out_shape=jax.ShapeDtypeStruct((R, C), x.dtype),
        grid_spec=pltpu.PrefetchScalarGridSpec(
            num_scalar_prefetch=0,
            grid=grid,
            in_specs=[spec, spec],
            out_specs=spec,
        ),
        compiler_params=pltpu.CompilerParams(
            dimension_semantics=("parallel", "parallel"),
            vmem_limit_bytes=_VMEM_LIMIT_BYTES,
        ),
        cost_estimate=pl.CostEstimate(
            flops=3 * n, transcendentals=0, bytes_accessed=3 * n * itemsize),
    )(x2, r2)

    return out.reshape(orig_shape)


if __name__ == "__main__":
    key = jax.random.PRNGKey(0)
    t = 0.3                       # module's __init__ parameter (static)
    den = sqrt((1.0 - t) ** 2 + t ** 2)

    # (shape, dtype, per-call tile budget override) covering:
    #   tiny-bypass, single-block, multi-block pipeline, bf16 (f32 in-kernel
    #   math + 16-row sublane tile), and the zero-copy awkward-size path.
    cases = [
        ((2, 4, 16, 16),    jnp.float32,  None),        # tiny -> plain XLA
        ((2, 16, 64, 64),   jnp.float32,  None),        # (16, 8192) single block
        ((2, 32, 64, 128),  jnp.float32,  512 * 1024),  # 4 row blocks, pipelined
        ((2, 32, 64, 128),  jnp.bfloat16, None),        # bf16, f32 math in kernel
        ((2, 7, 17, 517),   jnp.float32,  None),        # n % 128 != 0, no pad/slice
    ]

    for shape, dtype, tile_bytes in cases:
        key, kx, kr = jax.random.split(key, 3)
        x = jax.random.normal(kx, shape, dtype=jnp.float32).astype(dtype)
        res = jax.random.normal(kr, shape, dtype=jnp.float32).astype(dtype)

        if tile_bytes is None:
            out = mp_add(x, res, t)
        else:
            out = mp_add(x, res, t, target_tile_bytes=tile_bytes)
        out = jax.block_until_ready(out)

        ref = ((x.astype(jnp.float32) * (1.0 - t)
                + res.astype(jnp.float32) * t) / den).astype(dtype)
        assert out.shape == shape and out.dtype == dtype
        tol = 1e-5 if dtype == jnp.float32 else 2e-2
        assert jnp.allclose(out.astype(jnp.float32), ref.astype(jnp.float32),
                            atol=tol, rtol=tol), f"mismatch @ {shape} {dtype}"

    print("KERNEL_OK")
</pallas_src>

<mosaic_0001>
module attributes {stable_mosaic.version = 11 : i64} {
  func.func @_mp_add_kernel(%arg0: i32, %arg1: i32, %arg2: memref<16x8192xf32, #tpu.memory_space<vmem>>, %arg3: memref<16x8192xf32, #tpu.memory_space<vmem>>, %arg4: memref<16x8192xf32, #tpu.memory_space<vmem>>) attributes {dimension_semantics = [#tpu.dimension_semantics<parallel>, #tpu.dimension_semantics<parallel>], iteration_bounds = array<i64: 1, 1>, scalar_prefetch = 0 : i64, scratch_operands = 0 : i64, tpu.core_type = #tpu.core_type<tc>, window_params = [{transform_indices = @transform_0, window_bounds = array<i64: 16, 8192>}, {transform_indices = @transform_1, window_bounds = array<i64: 16, 8192>}, {transform_indices = @transform_2, window_bounds = array<i64: 16, 8192>}]} {
    %c0 = arith.constant 0 : index
    %c0_0 = arith.constant 0 : index
    %0 = vector.load %arg2[%c0, %c0_0] : memref<16x8192xf32, #tpu.memory_space<vmem>>, vector<16x8192xf32>
    %c0_1 = arith.constant 0 : index
    %c0_2 = arith.constant 0 : index
    %1 = vector.load %arg3[%c0_1, %c0_2] : memref<16x8192xf32, #tpu.memory_space<vmem>>, vector<16x8192xf32>
    %cst = arith.constant 0.919145047 : f32
    %2 = vector.broadcast %cst : f32 to vector<16x8192xf32>
    %3 = arith.mulf %0, %2 : vector<16x8192xf32>
    %cst_3 = arith.constant 0.393919289 : f32
    %4 = vector.broadcast %cst_3 : f32 to vector<16x8192xf32>
    %5 = arith.mulf %1, %4 : vector<16x8192xf32>
    %6 = arith.addf %3, %5 : vector<16x8192xf32>
    %c0_4 = arith.constant 0 : index
    %c0_5 = arith.constant 0 : index
    %7 = vector.load %arg4[%c0_4, %c0_5] : memref<16x8192xf32, #tpu.memory_space<vmem>>, vector<16x8192xf32>
    tpu.vector_store %arg4[%c0_4, %c0_5], %6 {strides = array<i32>} : memref<16x8192xf32, #tpu.memory_space<vmem>>, vector<16x8192xf32>,
    return
  }
  func.func @transform_0(%arg0: i32, %arg1: i32) -> (i32, i32) {
    %c0_i32 = arith.constant 0 : i32
    return %arg0, %arg1 : i32, i32
  }
  func.func @transform_1(%arg0: i32, %arg1: i32) -> (i32, i32) {
    %c0_i32 = arith.constant 0 : i32
    return %arg0, %arg1 : i32, i32
  }
  func.func @transform_2(%arg0: i32, %arg1: i32) -> (i32, i32) {
    %c0_i32 = arith.constant 0 : i32
    return %arg0, %arg1 : i32, i32
  }
}

</mosaic_0001>

<bundles_post_ra>
// kernel: tpu_custom_call.1
= control target key start
LH: loop header
LB: loop body
LE: loop exit
PB: predicated region body
PF: predicated region fallthrough
CT: control target
= control target key end

     0   :  { %7 = vsyncpa [#allocation3], 0  ;;  %s935_s0 = inlined_call_operand.hbm [shape: f32[16,8192], index: 0, kind: input, shape index: {}]   ;;  %s936_s1 = inlined_call_operand.hbm [shape: f32[16,8192], index: 1, kind: input, shape index: {}]   ;;  %s937_s2 = inlined_call_operand.hbm [shape: f32[16,8192], index: 2, kind: output, shape index: {}]  }
   0x1   :  { %8 = vsyncpa [#allocation6], 0 }
   0x2   :  { %9 = vsyncpa [#allocation4], 0  ;;  %s897_s9 = smov [#allocation2]  }
   0x3   :  { %s15_s10 = sshll.u32 %s897_s9, 4  ;;  %s16_s10 = int_to_ptr.vmem [resolvable:$true] %s15_s10 }
   0x4   :  { %s839_s11 = scalar_lea.vmem %s16_s10, 16384  ;;  %p844_p1 = scmp.lt.s32.totalorder %s16_s10, %s16_s10 }
   0x5   :  { %p840_p0 = scmp.ne.s32.totalorder %s16_s10, %s839_s11  ;;  %p845_p2 = scmp.lt.s32.totalorder %s839_s11, %s839_s11 }
   0x7   :  { %p846_p3 = por %p845_p2, %p844_p1 }
   0x9   :  { %p847_p4 = pnand %p846_p3, %p840_p0 }
   0xb   :  { %850 = shalt.err (!%p847_p4)
}
   0xc   :  { %s898_s12 = smov 8192   ;;  %s899_s13 = smov 512  }
   0xd   :  { %21 = dma.hbm_to_vmem [thread:$0]  %s935_s0, 16384, %s16_s10, [#allocation3], %s898_s12, %s898_s12, %s899_s13  }
   0xe   :  { %s900_s16 = smov [#allocation5]  }
   0xf   :  { %s27_s17 = sshll.u32 %s900_s16, 4  ;;  %s28_s17 = int_to_ptr.vmem [resolvable:$true] %s27_s17 }
  0x10   :  { %s859_s18 = scalar_lea.vmem %s28_s17, 16384  ;;  %p864_p6 = scmp.lt.s32.totalorder %s28_s17, %s28_s17 }
  0x11   :  { %p860_p5 = scmp.ne.s32.totalorder %s28_s17, %s859_s18  ;;  %p865_p7 = scmp.lt.s32.totalorder %s859_s18, %s859_s18 }
  0x13   :  { %p866_p8 = por %p865_p7, %p864_p6 }
  0x15   :  { %p867_p9 = pnand %p866_p8, %p860_p5 }
  0x17   :  { %870 = shalt.err (!%p867_p9)
}
  0x18   :  { %33 = dma.hbm_to_vmem [thread:$0]  %s936_s1, 16384, %s28_s17, [#allocation6], %s898_s12, %s898_s12, %s899_s13  }
  0x19   :  { %891 = dma.done.wait [#allocation3], 16384  }
  0x1a   :  { %892 = vsyncadd [#allocation3], 4294950912 }
  0x1b   :  { %893 = dma.done.wait [#allocation6], 16384  }
  0x1c   :  { %894 = vsyncadd [#allocation6], 4294950912  ;;  %v40_v0 = vld [vmem:[#allocation2] sm:$0xff]  ;;  %v41_v2 = vld [vmem:[#allocation2 + $0x8] sm:$0xff]  ;;  %s901_s0 = smov [#allocation7]  }
  0x1d   :  { %v168_v1 = vld [vmem:[#allocation5] sm:$0xff]  ;;  %v296_v3 = vmul.f32 0.91914505, %v40_v0  ;;  %v169_v5 = vld [vmem:[#allocation5 + $0x8] sm:$0xff]  ;;  %v42_v6 = vld [vmem:[#allocation2 + $0x10] sm:$0xff]  ;;  %s813_s1 = sshll.u32 %s901_s0, 4  ;;  %s814_s1 = int_to_ptr.vmem [resolvable:$true] %s813_s1 }
  0x1e   :  { %v424_v4 = vmul.f32 0.3939193, %v168_v1  ;;  %v297_v7 = vmul.f32 0.91914505, %v41_v2  ;;  %v425_v8 = vmul.f32 0.3939193, %v169_v5  ;;  %p876_p11 = scmp.lt.s32.totalorder %s814_s1, %s814_s1 }
  0x1f   :  { %v170_v9 = vld [vmem:[#allocation5 + $0x10] sm:$0xff]  ;;  %v43_v10 = vld [vmem:[#allocation2 + $0x18] sm:$0xff]  ;;  %v298_v12 = vmul.f32 0.91914505, %v42_v6  ;;  %v44_v15 = vld [vmem:[#allocation2 + $0x20] sm:$0xff]  ;;  %s871_s21 = scalar_lea.vmem %s814_s1, 16384 }
  0x20   :  { %v552_v11 = vadd.f32 %v424_v4, %v296_v3  ;;  %v426_v13 = vmul.f32 0.3939193, %v170_v9  ;;  %v171_v14 = vld [vmem:[#allocation5 + $0x18] sm:$0xff]  ;;  %v553_v16 = vadd.f32 %v425_v8, %v297_v7  ;;  %v299_v17 = vmul.f32 0.91914505, %v43_v10  ;;  %v172_v19 = vld [vmem:[#allocation5 + $0x20] sm:$0xff]  ;;  %p872_p10 = scmp.ne.s32.totalorder %s814_s1, %s871_s21  ;;  %p877_p12 = scmp.lt.s32.totalorder %s871_s21, %s871_s21 }
  0x21   :  { %v427_v18 = vmul.f32 0.3939193, %v171_v14  ;;  %v45_v20 = vld [vmem:[#allocation2 + $0x28] sm:$0xff]  ;;  %v300_v22 = vmul.f32 0.91914505, %v44_v15  ;;  %v46_v25 = vld [vmem:[#allocation2 + $0x30] sm:$0xff] }
  0x22   :  { %680 = vst [vmem:[#allocation7] sm:$0xff] %v552_v11  ;;  %v554_v21 = vadd.f32 %v426_v13, %v298_v12  ;;  %v428_v23 = vmul.f32 0.3939193, %v172_v19  ;;  %v173_v24 = vld [vmem:[#allocation5 + $0x28] sm:$0xff]  ;;  %681 = vst [vmem:[#allocation7 + $0x8] sm:$0xff] %v553_v16  ;;  %v174_v29 = vld [vmem:[#allocation5 + $0x30] sm:$0xff]  ;;  %p878_p13 = por %p877_p12, %p876_p11 }
  0x23   :  { %v555_v26 = vadd.f32 %v427_v18, %v299_v17  ;;  %v301_v27 = vmul.f32 0.91914505, %v45_v20  ;;  %v429_v28 = vmul.f32 0.3939193, %v173_v24  ;;  %v47_v30 = vld [vmem:[#allocation2 + $0x38] sm:$0xff]  ;;  %v48_v35 = vld [vmem:[#allocation2 + $0x40] sm:$0xff] }
  0x24   :  { %682 = vst [vmem:[#allocation7 + $0x10] sm:$0xff] %v554_v21  ;;  %v556_v31 = vadd.f32 %v428_v23, %v300_v22  ;;  %v302_v32 = vmul.f32 0.91914505, %v46_v25  ;;  %v430_v33 = vmul.f32 0.3939193, %v174_v29  ;;  %v175_v34 = vld [vmem:[#allocation5 + $0x38] sm:$0xff]  ;;  %p879_p0 = pnand %p878_p13, %p872_p10 }
  0x25   :  { %683 = vst [vmem:[#allocation7 + $0x18] sm:$0xff] %v555_v26  ;;  %v557_v36 = vadd.f32 %v429_v28, %v301_v27  ;;  %v303_v37 = vmul.f32 0.91914505, %v47_v30  ;;  %v431_v38 = vmul.f32 0.3939193, %v175_v34  ;;  %v176_v39 = vld [vmem:[#allocation5 + $0x40] sm:$0xff] }
  0x26   :  { %v49_v40 = vld [vmem:[#allocation2 + $0x48] sm:$0xff]  ;;  %684 = vst [vmem:[#allocation7 + $0x20] sm:$0xff] %v556_v31  ;;  %v558_v41 = vadd.f32 %v430_v33, %v302_v32  ;;  %v304_v42 = vmul.f32 0.91914505, %v48_v35  ;;  %v432_v43 = vmul.f32 0.3939193, %v176_v39 }
  0x27   :  { %v177_v44 = vld [vmem:[#allocation5 + $0x48] sm:$0xff]  ;;  %v50_v45 = vld [vmem:[#allocation2 + $0x50] sm:$0xff]  ;;  %685 = vst [vmem:[#allocation7 + $0x28] sm:$0xff] %v557_v36  ;;  %v559_v46 = vadd.f32 %v431_v38, %v303_v37  ;;  %v305_v47 = vmul.f32 0.91914505, %v49_v40  ;;  %v51_v50 = vld [vmem:[#allocation2 + $0x58] sm:$0xff] }
  0x28   :  { %v433_v48 = vmul.f32 0.3939193, %v177_v44  ;;  %v178_v49 = vld [vmem:[#allocation5 + $0x50] sm:$0xff]  ;;  %686 = vst [vmem:[#allocation7 + $0x30] sm:$0xff] %v558_v41  ;;  %v560_v51 = vadd.f32 %v432_v43, %v304_v42  ;;  %v306_v52 = vmul.f32 0.91914505, %v50_v45 }
  0x29   :  { %v434_v53 = vmul.f32 0.3939193, %v178_v49  ;;  %v179_v54 = vld [vmem:[#allocation5 + $0x58] sm:$0xff]  ;;  %v52_v55 = vld [vmem:[#allocation2 + $0x60] sm:$0xff]  ;;  %687 = vst [vmem:[#allocation7 + $0x38] sm:$0xff] %v559_v46  ;;  %v53_v60 = vld [vmem:[#allocation2 + $0x68] sm:$0xff] }
  0x2a   :  { %v561_v56 = vadd.f32 %v433_v48, %v305_v47  ;;  %v307_v57 = vmul.f32 0.91914505, %v51_v50  ;;  %v435_v58 = vmul.f32 0.3939193, %v179_v54  ;;  %v180_v59 = vld [vmem:[#allocation5 + $0x60] sm:$0xff]  ;;  %688 = vst [vmem:[#allocation7 + $0x40] sm:$0xff] %v560_v51 }
  0x2b   :  { %v562_v61 = vadd.f32 %v434_v53, %v306_v52  ;;  %v308_v62 = vmul.f32 0.91914505, %v52_v55  ;;  %v436_v63 = vmul.f32 0.3939193, %v180_v59  ;;  %v181_v0 = vld [vmem:[#allocation5 + $0x68] sm:$0xff]  ;;  %v54_v1 = vld [vmem:[#allocation2 + $0x70] sm:$0xff] }
  0x2c   :  { %689 = vst [vmem:[#allocation7 + $0x48] sm:$0xff] %v561_v56  ;;  %v563_v2 = vadd.f32 %v435_v58, %v307_v57  ;;  %v309_v3 = vmul.f32 0.91914505, %v53_v60  ;;  %v437_v4 = vmul.f32 0.3939193, %v181_v0  ;;  %v182_v5 = vld [vmem:[#allocation5 + $0x70] sm:$0xff] }
  0x2d   :  { %v55_v6 = vld [vmem:[#allocation2 + $0x78] sm:$0xff]  ;;  %690 = vst [vmem:[#allocation7 + $0x50] sm:$0xff] %v562_v61  ;;  %v564_v7 = vadd.f32 %v436_v63, %v308_v62  ;;  %v310_v8 = vmul.f32 0.91914505, %v54_v1  ;;  %v438_v9 = vmul.f32 0.3939193, %v182_v5 }
  0x2e   :  { %v183_v10 = vld [vmem:[#allocation5 + $0x78] sm:$0xff]  ;;  %v56_v11 = vld [vmem:[#allocation2 + $0x80] sm:$0xff]  ;;  %691 = vst [vmem:[#allocation7 + $0x58] sm:$0xff] %v563_v2  ;;  %v565_v12 = vadd.f32 %v437_v4, %v309_v3  ;;  %v311_v13 = vmul.f32 0.91914505, %v55_v6  ;;  %v57_v16 = vld [vmem:[#allocation2 + $0x88] sm:$0xff] }
  0x2f   :  { %v439_v14 = vmul.f32 0.3939193, %v183_v10  ;;  %v184_v15 = vld [vmem:[#allocation5 + $0x80] sm:$0xff]  ;;  %692 = vst [vmem:[#allocation7 + $0x60] sm:$0xff] %v564_v7  ;;  %v566_v17 = vadd.f32 %v438_v9, %v310_v8  ;;  %v312_v18 = vmul.f32 0.91914505, %v56_v11 }
  0x30   :  { %v440_v19 = vmul.f32 0.3939193, %v184_v15  ;;  %v185_v20 = vld [vmem:[#allocation5 + $0x88] sm:$0xff]  ;;  %v58_v21 = vld [vmem:[#allocation2 + $0x90] sm:$0xff]  ;;  %693 = vst [vmem:[#allocation7 + $0x68] sm:$0xff] %v565_v12  ;;  %v59_v26 = vld [vmem:[#allocation2 + $0x98] sm:$0xff] }
  0x31   :  { %v567_v22 = vadd.f32 %v439_v14, %v311_v13  ;;  %v313_v23 = vmul.f32 0.91914505, %v57_v16  ;;  %v441_v24 = vmul.f32 0.3939193, %v185_v20  ;;  %v186_v25 = vld [vmem:[#allocation5 + $0x90] sm:$0xff]  ;;  %694 = vst [vmem:[#allocation7 + $0x70] sm:$0xff] %v566_v17 }
  0x32   :  { %v568_v27 = vadd.f32 %v440_v19, %v312_v18  ;;  %v314_v28 = vmul.f32 0.91914505, %v58_v21  ;;  %v442_v29 = vmul.f32 0.3939193, %v186_v25  ;;  %v187_v30 = vld [vmem:[#allocation5 + $0x98] sm:$0xff]  ;;  %v60_v31 = vld [vmem:[#allocation2 + $0xa0] sm:$0xff] }
  0x33   :  { %695 = vst [vmem:[#allocation7 + $0x78] sm:$0xff] %v567_v22  ;;  %v569_v32 = vadd.f32 %v441_v24, %v313_v23  ;;  %v315_v33 = vmul.f32 0.91914505, %v59_v26  ;;  %v443_v34 = vmul.f32 0.3939193, %v187_v30  ;;  %v188_v35 = vld [vmem:[#allocation5 + $0xa0] sm:$0xff] }
  0x34   :  { %v61_v36 = vld [vmem:[#allocation2 + $0xa8] sm:$0xff]  ;;  %696 = vst [vmem:[#allocation7 + $0x80] sm:$0xff] %v568_v27  ;;  %v570_v37 = vadd.f32 %v442_v29, %v314_v28  ;;  %v316_v38 = vmul.f32 0.91914505, %v60_v31  ;;  %v444_v39 = vmul.f32 0.3939193, %v188_v35 }
  0x35   :  { %v189_v40 = vld [vmem:[#allocation5 + $0xa8] sm:$0xff]  ;;  %v62_v41 = vld [vmem:[#allocation2 + $0xb0] sm:$0xff]  ;;  %697 = vst [vmem:[#allocation7 + $0x88] sm:$0xff] %v569_v32  ;;  %v571_v42 = vadd.f32 %v443_v34, %v315_v33  ;;  %v317_v43 = vmul.f32 0.91914505, %v61_v36  ;;  %v63_v46 = vld [vmem:[#allocation2 + $0xb8] sm:$0xff] }
  0x36   :  { %v445_v44 = vmul.f32 0.3939193, %v189_v40  ;;  %v190_v45 = vld [vmem:[#allocation5 + $0xb0] sm:$0xff]  ;;  %698 = vst [vmem:[#allocation7 + $0x90] sm:$0xff] %v570_v37  ;;  %v572_v47 = vadd.f32 %v444_v39, %v316_v38  ;;  %v318_v48 = vmul.f32 0.91914505, %v62_v41 }
  0x37   :  { %v446_v49 = vmul.f32 0.3939193, %v190_v45  ;;  %v191_v50 = vld [vmem:[#allocation5 + $0xb8] sm:$0xff]  ;;  %v64_v51 = vld [vmem:[#allocation2 + $0xc0] sm:$0xff]  ;;  %699 = vst [vmem:[#allocation7 + $0x98] sm:$0xff] %v571_v42  ;;  %v65_v56 = vld [vmem:[#allocation2 + $0xc8] sm:$0xff] }
  0x38   :  { %v573_v52 = vadd.f32 %v445_v44, %v317_v43  ;;  %v319_v53 = vmul.f32 0.91914505, %v63_v46  ;;  %v447_v54 = vmul.f32 0.3939193, %v191_v50  ;;  %v192_v55 = vld [vmem:[#allocation5 + $0xc0] sm:$0xff]  ;;  %700 = vst [vmem:[#allocation7 + $0xa0] sm:$0xff] %v572_v47 }
  0x39   :  { %v574_v57 = vadd.f32 %v446_v49, %v318_v48  ;;  %v320_v58 = vmul.f32 0.91914505, %v64_v51  ;;  %v448_v59 = vmul.f32 0.3939193, %v192_v55  ;;  %v193_v60 = vld [vmem:[#allocation5 + $0xc8] sm:$0xff]  ;;  %v66_v61 = vld [vmem:[#allocation2 + $0xd0] sm:$0xff] }
  0x3a   :  { %701 = vst [vmem:[#allocation7 + $0xa8] sm:$0xff] %v573_v52  ;;  %v575_v62 = vadd.f32 %v447_v54, %v319_v53  ;;  %v321_v63 = vmul.f32 0.91914505, %v65_v56  ;;  %v449_v0 = vmul.f32 0.3939193, %v193_v60  ;;  %v194_v1 = vld [vmem:[#allocation5 + $0xd0] sm:$0xff] }
  0x3b   :  { %v67_v2 = vld [vmem:[#allocation2 + $0xd8] sm:$0xff]  ;;  %702 = vst [vmem:[#allocation7 + $0xb0] sm:$0xff] %v574_v57  ;;  %v576_v3 = vadd.f32 %v448_v59, %v320_v58  ;;  %v322_v4 = vmul.f32 0.91914505, %v66_v61  ;;  %v450_v5 = vmul.f32 0.3939193, %v194_v1 }
  0x3c   :  { %v195_v6 = vld [vmem:[#allocation5 + $0xd8] sm:$0xff]  ;;  %v68_v7 = vld [vmem:[#allocation2 + $0xe0] sm:$0xff]  ;;  %703 = vst [vmem:[#allocation7 + $0xb8] sm:$0xff] %v575_v62  ;;  %v577_v8 = vadd.f32 %v449_v0, %v321_v63  ;;  %v323_v9 = vmul.f32 0.91914505, %v67_v2  ;;  %v69_v12 = vld [vmem:[#allocation2 + $0xe8] sm:$0xff] }
  0x3d   :  { %v451_v10 = vmul.f32 0.3939193, %v195_v6  ;;  %v196_v11 = vld [vmem:[#allocation5 + $0xe0] sm:$0xff]  ;;  %704 = vst [vmem:[#allocation7 + $0xc0] sm:$0xff] %v576_v3  ;;  %v578_v13 = vadd.f32 %v450_v5, %v322_v4  ;;  %v324_v14 = vmul.f32 0.91914505, %v68_v7 }
  0x3e   :  { %v452_v15 = vmul.f32 0.3939193, %v196_v11  ;;  %v197_v16 = vld [vmem:[#allocation5 + $0xe8] sm:$0xff]  ;;  %v70_v17 = vld [vmem:[#allocation2 + $0xf0] sm:$0xff]  ;;  %705 = vst [vmem:[#allocation7 + $0xc8] sm:$0xff] %v577_v8  ;;  %v71_v22 = vld [vmem:[#allocation2 + $0xf8] sm:$0xff] }
  0x3f   :  { %v579_v18 = vadd.f32 %v451_v10, %v323_v9  ;;  %v325_v19 = vmul.f32 0.91914505, %v69_v12  ;;  %v453_v20 = vmul.f32 0.3939193, %v197_v16  ;;  %v198_v21 = vld [vmem:[#allocation5 + $0xf0] sm:$0xff]  ;;  %706 = vst [vmem:[#allocation7 + $0xd0] sm:$0xff] %v578_v13 }
  0x40   :  { %v580_v23 = vadd.f32 %v452_v15, %v324_v14  ;;  %v326_v24 = vmul.f32 0.91914505, %v70_v17  ;;  %v454_v25 = vmul.f32 0.3939193, %v198_v21  ;;  %v199_v26 = vld [vmem:[#allocation5 + $0xf8] sm:$0xff]  ;;  %v72_v27 = vld [vmem:[#allocation2 + $0x100] sm:$0xff] }
  0x41   :  { %707 = vst [vmem:[#allocation7 + $0xd8] sm:$0xff] %v579_v18  ;;  %v581_v28 = vadd.f32 %v453_v20, %v325_v19  ;;  %v327_v29 = vmul.f32 0.91914505, %v71_v22  ;;  %v455_v30 = vmul.f32 0.3939193, %v199_v26  ;;  %v200_v31 = vld [vmem:[#allocation5 + $0x100] sm:$0xff] }
  0x42   :  { %v73_v32 = vld [vmem:[#allocation2 + $0x108] sm:$0xff]  ;;  %708 = vst [vmem:[#allocation7 + $0xe0] sm:$0xff] %v580_v23  ;;  %v582_v33 = vadd.f32 %v454_v25, %v326_v24  ;;  %v328_v34 = vmul.f32 0.91914505, %v72_v27  ;;  %v456_v35 = vmul.f32 0.3939193, %v200_v31 }
  0x43   :  { %v201_v36 = vld [vmem:[#allocation5 + $0x108] sm:$0xff]  ;;  %v74_v37 = vld [vmem:[#allocation2 + $0x110] sm:$0xff]  ;;  %709 = vst [vmem:[#allocation7 + $0xe8] sm:$0xff] %v581_v28  ;;  %v583_v38 = vadd.f32 %v455_v30, %v327_v29  ;;  %v329_v39 = vmul.f32 0.91914505, %v73_v32  ;;  %v75_v42 = vld [vmem:[#allocation2 + $0x118] sm:$0xff] }
  0x44   :  { %v457_v40 = vmul.f32 0.3939193, %v201_v36  ;;  %v202_v41 = vld [vmem:[#allocation5 + $0x110] sm:$0xff]  ;;  %710 = vst [vmem:[#allocation7 + $0xf0] sm:$0xff] %v582_v33  ;;  %v584_v43 = vadd.f32 %v456_v35, %v328_v34  ;;  %v330_v44 = vmul.f32 0.91914505, %v74_v37 }
  0x45   :  { %v458_v45 = vmul.f32 0.3939193, %v202_v41  ;;  %v203_v46 = vld [vmem:[#allocation5 + $0x118] sm:$0xff]  ;;  %v76_v47 = vld [vmem:[#allocation2 + $0x120] sm:$0xff]  ;;  %711 = vst [vmem:[#allocation7 + $0xf8] sm:$0xff] %v583_v38  ;;  %v77_v52 = vld [vmem:[#allocation2 + $0x128] sm:$0xff] }
  0x46   :  { %v585_v48 = vadd.f32 %v457_v40, %v329_v39  ;;  %v331_v49 = vmul.f32 0.91914505, %v75_v42  ;;  %v459_v50 = vmul.f32 0.3939193, %v203_v46  ;;  %v204_v51 = vld [vmem:[#allocation5 + $0x120] sm:$0xff]  ;;  %712 = vst [vmem:[#allocation7 + $0x100] sm:$0xff] %v584_v43 }
  0x47   :  { %v586_v53 = vadd.f32 %v458_v45, %v330_v44  ;;  %v332_v54 = vmul.f32 0.91914505, %v76_v47  ;;  %v460_v55 = vmul.f32 0.3939193, %v204_v51  ;;  %v205_v56 = vld [vmem:[#allocation5 + $0x128] sm:$0xff]  ;;  %v78_v57 = vld [vmem:[#allocation2 + $0x130] sm:$0xff] }
  0x48   :  { %713 = vst [vmem:[#allocation7 + $0x108] sm:$0xff] %v585_v48  ;;  %v587_v58 = vadd.f32 %v459_v50, %v331_v49  ;;  %v333_v59 = vmul.f32 0.91914505, %v77_v52  ;;  %v461_v60 = vmul.f32 0.3939193, %v205_v56  ;;  %v206_v61 = vld [vmem:[#allocation5 + $0x130] sm:$0xff] }
  0x49   :  { %v79_v62 = vld [vmem:[#allocation2 + $0x138] sm:$0xff]  ;;  %714 = vst [vmem:[#allocation7 + $0x110] sm:$0xff] %v586_v53  ;;  %v588_v63 = vadd.f32 %v460_v55, %v332_v54  ;;  %v334_v0 = vmul.f32 0.91914505, %v78_v57  ;;  %v462_v1 = vmul.f32 0.3939193, %v206_v61 }
  0x4a   :  { %v207_v2 = vld [vmem:[#allocation5 + $0x138] sm:$0xff]  ;;  %v80_v3 = vld [vmem:[#allocation2 + $0x140] sm:$0xff]  ;;  %715 = vst [vmem:[#allocation7 + $0x118] sm:$0xff] %v587_v58  ;;  %v589_v4 = vadd.f32 %v461_v60, %v333_v59  ;;  %v335_v5 = vmul.f32 0.91914505, %v79_v62  ;;  %v81_v8 = vld [vmem:[#allocation2 + $0x148] sm:$0xff] }
  0x4b   :  { %v463_v6 = vmul.f32 0.3939193, %v207_v2  ;;  %v208_v7 = vld [vmem:[#allocation5 + $0x140] sm:$0xff]  ;;  %716 = vst [vmem:[#allocation7 + $0x120] sm:$0xff] %v588_v63  ;;  %v590_v9 = vadd.f32 %v462_v1, %v334_v0  ;;  %v336_v10 = vmul.f32 0.91914505, %v80_v3 }
  0x4c   :  { %v464_v11 = vmul.f32 0.3939193, %v208_v7  ;;  %v209_v12 = vld [vmem:[#allocation5 + $0x148] sm:$0xff]  ;;  %v82_v13 = vld [vmem:[#allocation2 + $0x150] sm:$0xff]  ;;  %717 = vst [vmem:[#allocation7 + $0x128] sm:$0xff] %v589_v4  ;;  %v83_v18 = vld [vmem:[#allocation2 + $0x158] sm:$0xff] }
  0x4d   :  { %v591_v14 = vadd.f32 %v463_v6, %v335_v5  ;;  %v337_v15 = vmul.f32 0.91914505, %v81_v8  ;;  %v465_v16 = vmul.f32 0.3939193, %v209_v12  ;;  %v210_v17 = vld [vmem:[#allocation5 + $0x150] sm:$0xff]  ;;  %718 = vst [vmem:[#allocation7 + $0x130] sm:$0xff] %v590_v9 }
  0x4e   :  { %v592_v19 = vadd.f32 %v464_v11, %v336_v10  ;;  %v338_v20 = vmul.f32 0.91914505, %v82_v13  ;;  %v466_v21 = vmul.f32 0.3939193, %v210_v17  ;;  %v211_v22 = vld [vmem:[#allocation5 + $0x158] sm:$0xff]  ;;  %v84_v23 = vld [vmem:[#allocation2 + $0x160] sm:$0xff] }
  0x4f   :  { %719 = vst [vmem:[#allocation7 + $0x138] sm:$0xff] %v591_v14  ;;  %v593_v24 = vadd.f32 %v465_v16, %v337_v15  ;;  %v339_v25 = vmul.f32 0.91914505, %v83_v18  ;;  %v467_v26 = vmul.f32 0.3939193, %v211_v22  ;;  %v212_v27 = vld [vmem:[#allocation5 + $0x160] sm:$0xff] }
  0x50   :  { %v85_v28 = vld [vmem:[#allocation2 + $0x168] sm:$0xff]  ;;  %720 = vst [vmem:[#allocation7 + $0x140] sm:$0xff] %v592_v19  ;;  %v594_v29 = vadd.f32 %v466_v21, %v338_v20  ;;  %v340_v30 = vmul.f32 0.91914505, %v84_v23  ;;  %v468_v31 = vmul.f32 0.3939193, %v212_v27 }
  0x51   :  { %v213_v32 = vld [vmem:[#allocation5 + $0x168] sm:$0xff]  ;;  %v86_v33 = vld [vmem:[#allocation2 + $0x170] sm:$0xff]  ;;  %721 = vst [vmem:[#allocation7 + $0x148] sm:$0xff] %v593_v24  ;;  %v595_v34 = vadd.f32 %v467_v26, %v339_v25  ;;  %v341_v35 = vmul.f32 0.91914505, %v85_v28  ;;  %v87_v38 = vld [vmem:[#allocation2 + $0x178] sm:$0xff] }
  0x52   :  { %v469_v36 = vmul.f32 0.3939193, %v213_v32  ;;  %v214_v37 = vld [vmem:[#allocation5 + $0x170] sm:$0xff]  ;;  %722 = vst [vmem:[#allocation7 + $0x150] sm:$0xff] %v594_v29  ;;  %v596_v39 = vadd.f32 %v468_v31, %v340_v30  ;;  %v342_v40 = vmul.f32 0.91914505, %v86_v33 }
  0x53   :  { %v470_v41 = vmul.f32 0.3939193, %v214_v37  ;;  %v215_v42 = vld [vmem:[#allocation5 + $0x178] sm:$0xff]  ;;  %v88_v43 = vld [vmem:[#allocation2 + $0x180] sm:$0xff]  ;;  %723 = vst [vmem:[#allocation7 + $0x158] sm:$0xff] %v595_v34  ;;  %v89_v48 = vld [vmem:[#allocation2 + $0x188] sm:$0xff] }
  0x54   :  { %v597_v44 = vadd.f32 %v469_v36, %v341_v35  ;;  %v343_v45 = vmul.f32 0.91914505, %v87_v38  ;;  %v471_v46 = vmul.f32 0.3939193, %v215_v42  ;;  %v216_v47 = vld [vmem:[#allocation5 + $0x180] sm:$0xff]  ;;  %724 = vst [vmem:[#allocation7 + $0x160] sm:$0xff] %v596_v39 }
  0x55   :  { %v598_v49 = vadd.f32 %v470_v41, %v342_v40  ;;  %v344_v50 = vmul.f32 0.91914505, %v88_v43  ;;  %v472_v51 = vmul.f32 0.3939193, %v216_v47  ;;  %v217_v52 = vld [vmem:[#allocation5 + $0x188] sm:$0xff]  ;;  %v90_v53 = vld [vmem:[#allocation2 + $0x190] sm:$0xff] }
  0x56   :  { %725 = vst [vmem:[#allocation7 + $0x168] sm:$0xff] %v597_v44  ;;  %v599_v54 = vadd.f32 %v471_v46, %v343_v45  ;;  %v345_v55 = vmul.f32 0.91914505, %v89_v48  ;;  %v473_v56 = vmul.f32 0.3939193, %v217_v52  ;;  %v218_v57 = vld [vmem:[#allocation5 + $0x190] sm:$0xff] }
  0x57   :  { %v91_v58 = vld [vmem:[#allocation2 + $0x198] sm:$0xff]  ;;  %726 = vst [vmem:[#allocation7 + $0x170] sm:$0xff] %v598_v49  ;;  %v600_v59 = vadd.f32 %v472_v51, %v344_v50  ;;  %v346_v60 = vmul.f32 0.91914505, %v90_v53  ;;  %v474_v61 = vmul.f32 0.3939193, %v218_v57 }
  0x58   :  { %v219_v62 = vld [vmem:[#allocation5 + $0x198] sm:$0xff]  ;;  %v92_v63 = vld [vmem:[#allocation2 + $0x1a0] sm:$0xff]  ;;  %727 = vst [vmem:[#allocation7 + $0x178] sm:$0xff] %v599_v54  ;;  %v601_v0 = vadd.f32 %v473_v56, %v345_v55  ;;  %v347_v1 = vmul.f32 0.91914505, %v91_v58  ;;  %v93_v4 = vld [vmem:[#allocation2 + $0x1a8] sm:$0xff] }
  0x59   :  { %v475_v2 = vmul.f32 0.3939193, %v219_v62  ;;  %v220_v3 = vld [vmem:[#allocation5 + $0x1a0] sm:$0xff]  ;;  %728 = vst [vmem:[#allocation7 + $0x180] sm:$0xff] %v600_v59  ;;  %v602_v5 = vadd.f32 %v474_v61, %v346_v60  ;;  %v348_v6 = vmul.f32 0.91914505, %v92_v63 }
  0x5a   :  { %v476_v7 = vmul.f32 0.3939193, %v220_v3  ;;  %v221_v8 = vld [vmem:[#allocation5 + $0x1a8] sm:$0xff]  ;;  %v94_v9 = vld [vmem:[#allocation2 + $0x1b0] sm:$0xff]  ;;  %729 = vst [vmem:[#allocation7 + $0x188] sm:$0xff] %v601_v0  ;;  %v95_v14 = vld [vmem:[#allocation2 + $0x1b8] sm:$0xff] }
  0x5b   :  { %v603_v10 = vadd.f32 %v475_v2, %v347_v1  ;;  %v349_v11 = vmul.f32 0.91914505, %v93_v4  ;;  %v477_v12 = vmul.f32 0.3939193, %v221_v8  ;;  %v222_v13 = vld [vmem:[#allocation5 + $0x1b0] sm:$0xff]  ;;  %730 = vst [vmem:[#allocation7 + $0x190] sm:$0xff] %v602_v5 }
  0x5c   :  { %v604_v15 = vadd.f32 %v476_v7, %v348_v6  ;;  %v350_v16 = vmul.f32 0.91914505, %v94_v9  ;;  %v478_v17 = vmul.f32 0.3939193, %v222_v13  ;;  %v223_v18 = vld [vmem:[#allocation5 + $0x1b8] sm:$0xff]  ;;  %v96_v19 = vld [vmem:[#allocation2 + $0x1c0] sm:$0xff] }
  0x5d   :  { %731 = vst [vmem:[#allocation7 + $0x198] sm:$0xff] %v603_v10  ;;  %v605_v20 = vadd.f32 %v477_v12, %v349_v11  ;;  %v351_v21 = vmul.f32 0.91914505, %v95_v14  ;;  %v479_v22 = vmul.f32 0.3939193, %v223_v18  ;;  %v224_v23 = vld [vmem:[#allocation5 + $0x1c0] sm:$0xff] }
  0x5e   :  { %v97_v24 = vld [vmem:[#allocation2 + $0x1c8] sm:$0xff]  ;;  %732 = vst [vmem:[#allocation7 + $0x1a0] sm:$0xff] %v604_v15  ;;  %v606_v25 = vadd.f32 %v478_v17, %v350_v16  ;;  %v352_v26 = vmul.f32 0.91914505, %v96_v19  ;;  %v480_v27 = vmul.f32 0.3939193, %v224_v23 }
  0x5f   :  { %v225_v28 = vld [vmem:[#allocation5 + $0x1c8] sm:$0xff]  ;;  %v98_v29 = vld [vmem:[#allocation2 + $0x1d0] sm:$0xff]  ;;  %733 = vst [vmem:[#allocation7 + $0x1a8] sm:$0xff] %v605_v20  ;;  %v607_v30 = vadd.f32 %v479_v22, %v351_v21  ;;  %v353_v31 = vmul.f32 0.91914505, %v97_v24  ;;  %v99_v34 = vld [vmem:[#allocation2 + $0x1d8] sm:$0xff] }
  0x60   :  { %v481_v32 = vmul.f32 0.3939193, %v225_v28  ;;  %v226_v33 = vld [vmem:[#allocation5 + $0x1d0] sm:$0xff]  ;;  %734 = vst [vmem:[#allocation7 + $0x1b0] sm:$0xff] %v606_v25  ;;  %v608_v35 = vadd.f32 %v480_v27, %v352_v26  ;;  %v354_v36 = vmul.f32 0.91914505, %v98_v29 }
  0x61   :  { %v482_v37 = vmul.f32 0.3939193, %v226_v33  ;;  %v227_v38 = vld [vmem:[#allocation5 + $0x1d8] sm:$0xff]  ;;  %v100_v39 = vld [vmem:[#allocation2 + $0x1e0] sm:$0xff]  ;;  %735 = vst [vmem:[#allocation7 + $0x1b8] sm:$0xff] %v607_v30  ;;  %v101_v44 = vld [vmem:[#allocation2 + $0x1e8] sm:$0xff] }
  0x62   :  { %v609_v40 = vadd.f32 %v481_v32, %v353_v31  ;;  %v355_v41 = vmul.f32 0.91914505, %v99_v34  ;;  %v483_v42 = vmul.f32 0.3939193, %v227_v38  ;;  %v228_v43 = vld [vmem:[#allocation5 + $0x1e0] sm:$0xff]  ;;  %736 = vst [vmem:[#allocation7 + $0x1c0] sm:$0xff] %v608_v35 }
  0x63   :  { %v610_v45 = vadd.f32 %v482_v37, %v354_v36  ;;  %v356_v46 = vmul.f32 0.91914505, %v100_v39  ;;  %v484_v47 = vmul.f32 0.3939193, %v228_v43  ;;  %v229_v48 = vld [vmem:[#allocation5 + $0x1e8] sm:$0xff]  ;;  %v102_v49 = vld [vmem:[#allocation2 + $0x1f0] sm:$0xff] }
  0x64   :  { %737 = vst [vmem:[#allocation7 + $0x1c8] sm:$0xff] %v609_v40  ;;  %v611_v50 = vadd.f32 %v483_v42, %v355_v41  ;;  %v357_v51 = vmul.f32 0.91914505, %v101_v44  ;;  %v485_v52 = vmul.f32 0.3939193, %v229_v48  ;;  %v230_v53 = vld [vmem:[#allocation5 + $0x1f0] sm:$0xff] }
  0x65   :  { %v103_v54 = vld [vmem:[#allocation2 + $0x1f8] sm:$0xff]  ;;  %738 = vst [vmem:[#allocation7 + $0x1d0] sm:$0xff] %v610_v45  ;;  %v612_v55 = vadd.f32 %v484_v47, %v356_v46  ;;  %v358_v56 = vmul.f32 0.91914505, %v102_v49  ;;  %v486_v57 = vmul.f32 0.3939193, %v230_v53 }
  0x66   :  { %v231_v58 = vld [vmem:[#allocation5 + $0x1f8] sm:$0xff]  ;;  %v104_v59 = vld [vmem:[#allocation2 + $0x200] sm:$0xff]  ;;  %739 = vst [vmem:[#allocation7 + $0x1d8] sm:$0xff] %v611_v50  ;;  %v613_v60 = vadd.f32 %v485_v52, %v357_v51  ;;  %v359_v61 = vmul.f32 0.91914505, %v103_v54  ;;  %v105_v0 = vld [vmem:[#allocation2 + $0x208] sm:$0xff] }
  0x67   :  { %v487_v62 = vmul.f32 0.3939193, %v231_v58  ;;  %v232_v63 = vld [vmem:[#allocation5 + $0x200] sm:$0xff]  ;;  %740 = vst [vmem:[#allocation7 + $0x1e0] sm:$0xff] %v612_v55  ;;  %v614_v1 = vadd.f32 %v486_v57, %v358_v56  ;;  %v360_v2 = vmul.f32 0.91914505, %v104_v59 }
  0x68   :  { %v488_v3 = vmul.f32 0.3939193, %v232_v63  ;;  %v233_v4 = vld [vmem:[#allocation5 + $0x208] sm:$0xff]  ;;  %v106_v5 = vld [vmem:[#allocation2 + $0x210] sm:$0xff]  ;;  %741 = vst [vmem:[#allocation7 + $0x1e8] sm:$0xff] %v613_v60  ;;  %v107_v10 = vld [vmem:[#allocation2 + $0x218] sm:$0xff] }
  0x69   :  { %v615_v6 = vadd.f32 %v487_v62, %v359_v61  ;;  %v361_v7 = vmul.f32 0.91914505, %v105_v0  ;;  %v489_v8 = vmul.f32 0.3939193, %v233_v4  ;;  %v234_v9 = vld [vmem:[#allocation5 + $0x210] sm:$0xff]  ;;  %742 = vst [vmem:[#allocation7 + $0x1f0] sm:$0xff] %v614_v1 }
  0x6a   :  { %v616_v11 = vadd.f32 %v488_v3, %v360_v2  ;;  %v362_v12 = vmul.f32 0.91914505, %v106_v5  ;;  %v490_v13 = vmul.f32 0.3939193, %v234_v9  ;;  %v235_v14 = vld [vmem:[#allocation5 + $0x218] sm:$0xff]  ;;  %v108_v15 = vld [vmem:[#allocation2 + $0x220] sm:$0xff] }
  0x6b   :  { %743 = vst [vmem:[#allocation7 + $0x1f8] sm:$0xff] %v615_v6  ;;  %v617_v16 = vadd.f32 %v489_v8, %v361_v7  ;;  %v363_v17 = vmul.f32 0.91914505, %v107_v10  ;;  %v491_v18 = vmul.f32 0.3939193, %v235_v14  ;;  %v236_v19 = vld [vmem:[#allocation5 + $0x220] sm:$0xff] }
  0x6c   :  { %v109_v20 = vld [vmem:[#allocation2 + $0x228] sm:$0xff]  ;;  %744 = vst [vmem:[#allocation7 + $0x200] sm:$0xff] %v616_v11  ;;  %v618_v21 = vadd.f32 %v490_v13, %v362_v12  ;;  %v364_v22 = vmul.f32 0.91914505, %v108_v15  ;;  %v492_v23 = vmul.f32 0.3939193, %v236_v19 }
  0x6d   :  { %v237_v24 = vld [vmem:[#allocation5 + $0x228] sm:$0xff]  ;;  %v110_v25 = vld [vmem:[#allocation2 + $0x230] sm:$0xff]  ;;  %745 = vst [vmem:[#allocation7 + $0x208] sm:$0xff] %v617_v16  ;;  %v619_v26 = vadd.f32 %v491_v18, %v363_v17  ;;  %v365_v27 = vmul.f32 0.91914505, %v109_v20  ;;  %v111_v30 = vld [vmem:[#allocation2 + $0x238] sm:$0xff] }
  0x6e   :  { %v493_v28 = vmul.f32 0.3939193, %v237_v24  ;;  %v238_v29 = vld [vmem:[#allocation5 + $0x230] sm:$0xff]  ;;  %746 = vst [vmem:[#allocation7 + $0x210] sm:$0xff] %v618_v21  ;;  %v620_v31 = vadd.f32 %v492_v23, %v364_v22  ;;  %v366_v32 = vmul.f32 0.91914505, %v110_v25 }
  0x6f   :  { %v494_v33 = vmul.f32 0.3939193, %v238_v29  ;;  %v239_v34 = vld [vmem:[#allocation5 + $0x238] sm:$0xff]  ;;  %v112_v35 = vld [vmem:[#allocation2 + $0x240] sm:$0xff]  ;;  %747 = vst [vmem:[#allocation7 + $0x218] sm:$0xff] %v619_v26  ;;  %v113_v40 = vld [vmem:[#allocation2 + $0x248] sm:$0xff] }
  0x70   :  { %v621_v36 = vadd.f32 %v493_v28, %v365_v27  ;;  %v367_v37 = vmul.f32 0.91914505, %v111_v30  ;;  %v495_v38 = vmul.f32 0.3939193, %v239_v34  ;;  %v240_v39 = vld [vmem:[#allocation5 + $0x240] sm:$0xff]  ;;  %748 = vst [vmem:[#allocation7 + $0x220] sm:$0xff] %v620_v31 }
  0x71   :  { %v622_v41 = vadd.f32 %v494_v33, %v366_v32  ;;  %v368_v42 = vmul.f32 0.91914505, %v112_v35  ;;  %v496_v43 = vmul.f32 0.3939193, %v240_v39  ;;  %v241_v44 = vld [vmem:[#allocation5 + $0x248] sm:$0xff]  ;;  %v114_v45 = vld [vmem:[#allocation2 + $0x250] sm:$0xff] }
  0x72   :  { %749 = vst [vmem:[#allocation7 + $0x228] sm:$0xff] %v621_v36  ;;  %v623_v46 = vadd.f32 %v495_v38, %v367_v37  ;;  %v369_v47 = vmul.f32 0.91914505, %v113_v40  ;;  %v497_v48 = vmul.f32 0.3939193, %v241_v44  ;;  %v242_v49 = vld [vmem:[#allocation5 + $0x250] sm:$0xff] }
  0x73   :  { %v115_v50 = vld [vmem:[#allocation2 + $0x258] sm:$0xff]  ;;  %750 = vst [vmem:[#allocation7 + $0x230] sm:$0xff] %v622_v41  ;;  %v624_v51 = vadd.f32 %v496_v43, %v368_v42  ;;  %v370_v52 = vmul.f32 0.91914505, %v114_v45  ;;  %v498_v53 = vmul.f32 0.3939193, %v242_v49 }
  0x74   :  { %v243_v54 = vld [vmem:[#allocation5 + $0x258] sm:$0xff]  ;;  %v116_v55 = vld [vmem:[#allocation2 + $0x260] sm:$0xff]  ;;  %751 = vst [vmem:[#allocation7 + $0x238] sm:$0xff] %v623_v46  ;;  %v625_v56 = vadd.f32 %v497_v48, %v369_v47  ;;  %v371_v57 = vmul.f32 0.91914505, %v115_v50  ;;  %v117_v60 = vld [vmem:[#allocation2 + $0x268] sm:$0xff] }
  0x75   :  { %v499_v58 = vmul.f32 0.3939193, %v243_v54  ;;  %v244_v59 = vld [vmem:[#allocation5 + $0x260] sm:$0xff]  ;;  %752 = vst [vmem:[#allocation7 + $0x240] sm:$0xff] %v624_v51  ;;  %v626_v61 = vadd.f32 %v498_v53, %v370_v52  ;;  %v372_v62 = vmul.f32 0.91914505, %v116_v55 }
  0x76   :  { %v500_v63 = vmul.f32 0.3939193, %v244_v59  ;;  %v245_v0 = vld [vmem:[#allocation5 + $0x268] sm:$0xff]  ;;  %v118_v1 = vld [vmem:[#allocation2 + $0x270] sm:$0xff]  ;;  %753 = vst [vmem:[#allocation7 + $0x248] sm:$0xff] %v625_v56  ;;  %v119_v6 = vld [vmem:[#allocation2 + $0x278] sm:$0xff] }
  0x77   :  { %v627_v2 = vadd.f32 %v499_v58, %v371_v57  ;;  %v373_v3 = vmul.f32 0.91914505, %v117_v60  ;;  %v501_v4 = vmul.f32 0.3939193, %v245_v0  ;;  %v246_v5 = vld [vmem:[#allocation5 + $0x270] sm:$0xff]  ;;  %754 = vst [vmem:[#allocation7 + $0x250] sm:$0xff] %v626_v61 }
  0x78   :  { %v628_v7 = vadd.f32 %v500_v63, %v372_v62  ;;  %v374_v8 = vmul.f32 0.91914505, %v118_v1  ;;  %v502_v9 = vmul.f32 0.3939193, %v246_v5  ;;  %v247_v10 = vld [vmem:[#allocation5 + $0x278] sm:$0xff]  ;;  %v120_v11 = vld [vmem:[#allocation2 + $0x280] sm:$0xff] }
  0x79   :  { %755 = vst [vmem:[#allocation7 + $0x258] sm:$0xff] %v627_v2  ;;  %v629_v12 = vadd.f32 %v501_v4, %v373_v3  ;;  %v375_v13 = vmul.f32 0.91914505, %v119_v6  ;;  %v503_v14 = vmul.f32 0.3939193, %v247_v10  ;;  %v248_v15 = vld [vmem:[#allocation5 + $0x280] sm:$0xff] }
  0x7a   :  { %v121_v16 = vld [vmem:[#allocation2 + $0x288] sm:$0xff]  ;;  %756 = vst [vmem:[#allocation7 + $0x260] sm:$0xff] %v628_v7  ;;  %v630_v17 = vadd.f32 %v502_v9, %v374_v8  ;;  %v376_v18 = vmul.f32 0.91914505, %v120_v11  ;;  %v504_v19 = vmul.f32 0.3939193, %v248_v15 }
  0x7b   :  { %v249_v20 = vld [vmem:[#allocation5 + $0x288] sm:$0xff]  ;;  %v122_v21 = vld [vmem:[#allocation2 + $0x290] sm:$0xff]  ;;  %757 = vst [vmem:[#allocation7 + $0x268] sm:$0xff] %v629_v12  ;;  %v631_v22 = vadd.f32 %v503_v14, %v375_v13  ;;  %v377_v23 = vmul.f32 0.91914505, %v121_v16  ;;  %v123_v26 = vld [vmem:[#allocation2 + $0x298] sm:$0xff] }
  0x7c   :  { %v505_v24 = vmul.f32 0.3939193, %v249_v20  ;;  %v250_v25 = vld [vmem:[#allocation5 + $0x290] sm:$0xff]  ;;  %758 = vst [vmem:[#allocation7 + $0x270] sm:$0xff] %v630_v17  ;;  %v632_v27 = vadd.f32 %v504_v19, %v376_v18  ;;  %v378_v28 = vmul.f32 0.91914505, %v122_v21 }
  0x7d   :  { %v506_v29 = vmul.f32 0.3939193, %v250_v25  ;;  %v251_v30 = vld [vmem:[#allocation5 + $0x298] sm:$0xff]  ;;  %v124_v31 = vld [vmem:[#allocation2 + $0x2a0] sm:$0xff]  ;;  %759 = vst [vmem:[#allocation7 + $0x278] sm:$0xff] %v631_v22  ;;  %v125_v36 = vld [vmem:[#allocation2 + $0x2a8] sm:$0xff] }
  0x7e   :  { %v633_v32 = vadd.f32 %v505_v24, %v377_v23  ;;  %v379_v33 = vmul.f32 0.91914505, %v123_v26  ;;  %v507_v34 = vmul.f32 0.3939193, %v251_v30  ;;  %v252_v35 = vld [vmem:[#allocation5 + $0x2a0] sm:$0xff]  ;;  %760 = vst [vmem:[#allocation7 + $0x280] sm:$0xff] %v632_v27 }
  0x7f   :  { %v634_v37 = vadd.f32 %v506_v29, %v378_v28  ;;  %v380_v38 = vmul.f32 0.91914505, %v124_v31  ;;  %v508_v39 = vmul.f32 0.3939193, %v252_v35  ;;  %v253_v40 = vld [vmem:[#allocation5 + $0x2a8] sm:$0xff]  ;;  %v126_v41 = vld [vmem:[#allocation2 + $0x2b0] sm:$0xff] }
  0x80   :  { %761 = vst [vmem:[#allocation7 + $0x288] sm:$0xff] %v633_v32  ;;  %v635_v42 = vadd.f32 %v507_v34, %v379_v33  ;;  %v381_v43 = vmul.f32 0.91914505, %v125_v36  ;;  %v509_v44 = vmul.f32 0.3939193, %v253_v40  ;;  %v254_v45 = vld [vmem:[#allocation5 + $0x2b0] sm:$0xff] }
  0x81   :  { %v127_v46 = vld [vmem:[#allocation2 + $0x2b8] sm:$0xff]  ;;  %762 = vst [vmem:[#allocation7 + $0x290] sm:$0xff] %v634_v37  ;;  %v636_v47 = vadd.f32 %v508_v39, %v380_v38  ;;  %v382_v48 = vmul.f32 0.91914505, %v126_v41  ;;  %v510_v49 = vmul.f32 0.3939193, %v254_v45 }
  0x82   :  { %v255_v50 = vld [vmem:[#allocation5 + $0x2b8] sm:$0xff]  ;;  %v128_v51 = vld [vmem:[#allocation2 + $0x2c0] sm:$0xff]  ;;  %763 = vst [vmem:[#allocation7 + $0x298] sm:$0xff] %v635_v42  ;;  %v637_v52 = vadd.f32 %v509_v44, %v381_v43  ;;  %v383_v53 = vmul.f32 0.91914505, %v127_v46  ;;  %v129_v56 = vld [vmem:[#allocation2 + $0x2c8] sm:$0xff] }
  0x83   :  { %v511_v54 = vmul.f32 0.3939193, %v255_v50  ;;  %v256_v55 = vld [vmem:[#allocation5 + $0x2c0] sm:$0xff]  ;;  %764 = vst [vmem:[#allocation7 + $0x2a0] sm:$0xff] %v636_v47  ;;  %v638_v57 = vadd.f32 %v510_v49, %v382_v48  ;;  %v384_v58 = vmul.f32 0.91914505, %v128_v51 }
  0x84   :  { %v512_v59 = vmul.f32 0.3939193, %v256_v55  ;;  %v257_v60 = vld [vmem:[#allocation5 + $0x2c8] sm:$0xff]  ;;  %v130_v61 = vld [vmem:[#allocation2 + $0x2d0] sm:$0xff]  ;;  %765 = vst [vmem:[#allocation7 + $0x2a8] sm:$0xff] %v637_v52  ;;  %v131_v2 = vld [vmem:[#allocation2 + $0x2d8] sm:$0xff] }
  0x85   :  { %v639_v62 = vadd.f32 %v511_v54, %v383_v53  ;;  %v385_v63 = vmul.f32 0.91914505, %v129_v56  ;;  %v513_v0 = vmul.f32 0.3939193, %v257_v60  ;;  %v258_v1 = vld [vmem:[#allocation5 + $0x2d0] sm:$0xff]  ;;  %766 = vst [vmem:[#allocation7 + $0x2b0] sm:$0xff] %v638_v57 }
  0x86   :  { %v640_v3 = vadd.f32 %v512_v59, %v384_v58  ;;  %v386_v4 = vmul.f32 0.91914505, %v130_v61  ;;  %v514_v5 = vmul.f32 0.3939193, %v258_v1  ;;  %v259_v6 = vld [vmem:[#allocation5 + $0x2d8] sm:$0xff]  ;;  %v132_v7 = vld [vmem:[#allocation2 + $0x2e0] sm:$0xff] }
  0x87   :  { %767 = vst [vmem:[#allocation7 + $0x2b8] sm:$0xff] %v639_v62  ;;  %v641_v8 = vadd.f32 %v513_v0, %v385_v63  ;;  %v387_v9 = vmul.f32 0.91914505, %v131_v2  ;;  %v515_v10 = vmul.f32 0.3939193, %v259_v6  ;;  %v260_v11 = vld [vmem:[#allocation5 + $0x2e0] sm:$0xff] }
  0x88   :  { %v133_v12 = vld [vmem:[#allocation2 + $0x2e8] sm:$0xff]  ;;  %768 = vst [vmem:[#allocation7 + $0x2c0] sm:$0xff] %v640_v3  ;;  %v642_v13 = vadd.f32 %v514_v5, %v386_v4  ;;  %v388_v14 = vmul.f32 0.91914505, %v132_v7  ;;  %v516_v15 = vmul.f32 0.3939193, %v260_v11 }
  0x89   :  { %v261_v16 = vld [vmem:[#allocation5 + $0x2e8] sm:$0xff]  ;;  %v134_v17 = vld [vmem:[#allocation2 + $0x2f0] sm:$0xff]  ;;  %769 = vst [vmem:[#allocation7 + $0x2c8] sm:$0xff] %v641_v8  ;;  %v643_v18 = vadd.f32 %v515_v10, %v387_v9  ;;  %v389_v19 = vmul.f32 0.91914505, %v133_v12  ;;  %v135_v22 = vld [vmem:[#allocation2 + $0x2f8] sm:$0xff] }
  0x8a   :  { %v517_v20 = vmul.f32 0.3939193, %v261_v16  ;;  %v262_v21 = vld [vmem:[#allocation5 + $0x2f0] sm:$0xff]  ;;  %770 = vst [vmem:[#allocation7 + $0x2d0] sm:$0xff] %v642_v13  ;;  %v644_v23 = vadd.f32 %v516_v15, %v388_v14  ;;  %v390_v24 = vmul.f32 0.91914505, %v134_v17 }
  0x8b   :  { %v518_v25 = vmul.f32 0.3939193, %v262_v21  ;;  %v263_v26 = vld [vmem:[#allocation5 + $0x2f8] sm:$0xff]  ;;  %v136_v27 = vld [vmem:[#allocation2 + $0x300] sm:$0xff]  ;;  %771 = vst [vmem:[#allocation7 + $0x2d8] sm:$0xff] %v643_v18  ;;  %v137_v32 = vld [vmem:[#allocation2 + $0x308] sm:$0xff] }
  0x8c   :  { %v645_v28 = vadd.f32 %v517_v20, %v389_v19  ;;  %v391_v29 = vmul.f32 0.91914505, %v135_v22  ;;  %v519_v30 = vmul.f32 0.3939193, %v263_v26  ;;  %v264_v31 = vld [vmem:[#allocation5 + $0x300] sm:$0xff]  ;;  %772 = vst [vmem:[#allocation7 + $0x2e0] sm:$0xff] %v644_v23 }
  0x8d   :  { %v646_v33 = vadd.f32 %v518_v25, %v390_v24  ;;  %v392_v34 = vmul.f32 0.91914505, %v136_v27  ;;  %v520_v35 = vmul.f32 0.3939193, %v264_v31  ;;  %v265_v36 = vld [vmem:[#allocation5 + $0x308] sm:$0xff]  ;;  %v138_v37 = vld [vmem:[#allocation2 + $0x310] sm:$0xff] }
  0x8e   :  { %773 = vst [vmem:[#allocation7 + $0x2e8] sm:$0xff] %v645_v28  ;;  %v647_v38 = vadd.f32 %v519_v30, %v391_v29  ;;  %v393_v39 = vmul.f32 0.91914505, %v137_v32  ;;  %v521_v40 = vmul.f32 0.3939193, %v265_v36  ;;  %v266_v41 = vld [vmem:[#allocation5 + $0x310] sm:$0xff] }
  0x8f   :  { %v139_v42 = vld [vmem:[#allocation2 + $0x318] sm:$0xff]  ;;  %774 = vst [vmem:[#allocation7 + $0x2f0] sm:$0xff] %v646_v33  ;;  %v648_v43 = vadd.f32 %v520_v35, %v392_v34  ;;  %v394_v44 = vmul.f32 0.91914505, %v138_v37  ;;  %v522_v45 = vmul.f32 0.3939193, %v266_v41 }
  0x90   :  { %v267_v46 = vld [vmem:[#allocation5 + $0x318] sm:$0xff]  ;;  %v140_v47 = vld [vmem:[#allocation2 + $0x320] sm:$0xff]  ;;  %775 = vst [vmem:[#allocation7 + $0x2f8] sm:$0xff] %v647_v38  ;;  %v649_v48 = vadd.f32 %v521_v40, %v393_v39  ;;  %v395_v49 = vmul.f32 0.91914505, %v139_v42  ;;  %v141_v52 = vld [vmem:[#allocation2 + $0x328] sm:$0xff] }
  0x91   :  { %v523_v50 = vmul.f32 0.3939193, %v267_v46  ;;  %v268_v51 = vld [vmem:[#allocation5 + $0x320] sm:$0xff]  ;;  %776 = vst [vmem:[#allocation7 + $0x300] sm:$0xff] %v648_v43  ;;  %v650_v53 = vadd.f32 %v522_v45, %v394_v44  ;;  %v396_v54 = vmul.f32 0.91914505, %v140_v47 }
  0x92   :  { %v524_v55 = vmul.f32 0.3939193, %v268_v51  ;;  %v269_v56 = vld [vmem:[#allocation5 + $0x328] sm:$0xff]  ;;  %v142_v57 = vld [vmem:[#allocation2 + $0x330] sm:$0xff]  ;;  %777 = vst [vmem:[#allocation7 + $0x308] sm:$0xff] %v649_v48  ;;  %v143_v62 = vld [vmem:[#allocation2 + $0x338] sm:$0xff] }
  0x93   :  { %v651_v58 = vadd.f32 %v523_v50, %v395_v49  ;;  %v397_v59 = vmul.f32 0.91914505, %v141_v52  ;;  %v525_v60 = vmul.f32 0.3939193, %v269_v56  ;;  %v270_v61 = vld [vmem:[#allocation5 + $0x330] sm:$0xff]  ;;  %778 = vst [vmem:[#allocation7 + $0x310] sm:$0xff] %v650_v53 }
  0x94   :  { %v652_v63 = vadd.f32 %v524_v55, %v396_v54  ;;  %v398_v0 = vmul.f32 0.91914505, %v142_v57  ;;  %v526_v1 = vmul.f32 0.3939193, %v270_v61  ;;  %v271_v2 = vld [vmem:[#allocation5 + $0x338] sm:$0xff]  ;;  %v144_v3 = vld [vmem:[#allocation2 + $0x340] sm:$0xff] }
  0x95   :  { %779 = vst [vmem:[#allocation7 + $0x318] sm:$0xff] %v651_v58  ;;  %v653_v4 = vadd.f32 %v525_v60, %v397_v59  ;;  %v399_v5 = vmul.f32 0.91914505, %v143_v62  ;;  %v527_v6 = vmul.f32 0.3939193, %v271_v2  ;;  %v272_v7 = vld [vmem:[#allocation5 + $0x340] sm:$0xff] }
  0x96   :  { %v145_v8 = vld [vmem:[#allocation2 + $0x348] sm:$0xff]  ;;  %780 = vst [vmem:[#allocation7 + $0x320] sm:$0xff] %v652_v63  ;;  %v654_v9 = vadd.f32 %v526_v1, %v398_v0  ;;  %v400_v10 = vmul.f32 0.91914505, %v144_v3  ;;  %v528_v11 = vmul.f32 0.3939193, %v272_v7 }
  0x97   :  { %v273_v12 = vld [vmem:[#allocation5 + $0x348] sm:$0xff]  ;;  %v146_v13 = vld [vmem:[#allocation2 + $0x350] sm:$0xff]  ;;  %781 = vst [vmem:[#allocation7 + $0x328] sm:$0xff] %v653_v4  ;;  %v655_v14 = vadd.f32 %v527_v6, %v399_v5  ;;  %v401_v15 = vmul.f32 0.91914505, %v145_v8  ;;  %v147_v18 = vld [vmem:[#allocation2 + $0x358] sm:$0xff] }
  0x98   :  { %v529_v16 = vmul.f32 0.3939193, %v273_v12  ;;  %v274_v17 = vld [vmem:[#allocation5 + $0x350] sm:$0xff]  ;;  %782 = vst [vmem:[#allocation7 + $0x330] sm:$0xff] %v654_v9  ;;  %v656_v19 = vadd.f32 %v528_v11, %v400_v10  ;;  %v402_v20 = vmul.f32 0.91914505, %v146_v13 }
  0x99   :  { %v530_v21 = vmul.f32 0.3939193, %v274_v17  ;;  %v275_v22 = vld [vmem:[#allocation5 + $0x358] sm:$0xff]  ;;  %v148_v23 = vld [vmem:[#allocation2 + $0x360] sm:$0xff]  ;;  %783 = vst [vmem:[#allocation7 + $0x338] sm:$0xff] %v655_v14  ;;  %v149_v28 = vld [vmem:[#allocation2 + $0x368] sm:$0xff] }
  0x9a   :  { %v657_v24 = vadd.f32 %v529_v16, %v401_v15  ;;  %v403_v25 = vmul.f32 0.91914505, %v147_v18  ;;  %v531_v26 = vmul.f32 0.3939193, %v275_v22  ;;  %v276_v27 = vld [vmem:[#allocation5 + $0x360] sm:$0xff]  ;;  %784 = vst [vmem:[#allocation7 + $0x340] sm:$0xff] %v656_v19 }
  0x9b   :  { %v658_v29 = vadd.f32 %v530_v21, %v402_v20  ;;  %v404_v30 = vmul.f32 0.91914505, %v148_v23  ;;  %v532_v31 = vmul.f32 0.3939193, %v276_v27  ;;  %v277_v32 = vld [vmem:[#allocation5 + $0x368] sm:$0xff]  ;;  %v150_v33 = vld [vmem:[#allocation2 + $0x370] sm:$0xff] }
  0x9c   :  { %785 = vst [vmem:[#allocation7 + $0x348] sm:$0xff] %v657_v24  ;;  %v659_v34 = vadd.f32 %v531_v26, %v403_v25  ;;  %v405_v35 = vmul.f32 0.91914505, %v149_v28  ;;  %v533_v36 = vmul.f32 0.3939193, %v277_v32  ;;  %v278_v37 = vld [vmem:[#allocation5 + $0x370] sm:$0xff] }
  0x9d   :  { %v151_v38 = vld [vmem:[#allocation2 + $0x378] sm:$0xff]  ;;  %786 = vst [vmem:[#allocation7 + $0x350] sm:$0xff] %v658_v29  ;;  %v660_v39 = vadd.f32 %v532_v31, %v404_v30  ;;  %v406_v40 = vmul.f32 0.91914505, %v150_v33  ;;  %v534_v41 = vmul.f32 0.3939193, %v278_v37 }
  0x9e   :  { %v279_v42 = vld [vmem:[#allocation5 + $0x378] sm:$0xff]  ;;  %v152_v43 = vld [vmem:[#allocation2 + $0x380] sm:$0xff]  ;;  %787 = vst [vmem:[#allocation7 + $0x358] sm:$0xff] %v659_v34  ;;  %v661_v44 = vadd.f32 %v533_v36, %v405_v35  ;;  %v407_v45 = vmul.f32 0.91914505, %v151_v38  ;;  %v153_v48 = vld [vmem:[#allocation2 + $0x388] sm:$0xff] }
  0x9f   :  { %v535_v46 = vmul.f32 0.3939193, %v279_v42  ;;  %v280_v47 = vld [vmem:[#allocation5 + $0x380] sm:$0xff]  ;;  %788 = vst [vmem:[#allocation7 + $0x360] sm:$0xff] %v660_v39  ;;  %v662_v49 = vadd.f32 %v534_v41, %v406_v40  ;;  %v408_v50 = vmul.f32 0.91914505, %v152_v43 }
  0xa0   :  { %v536_v51 = vmul.f32 0.3939193, %v280_v47  ;;  %v281_v52 = vld [vmem:[#allocation5 + $0x388] sm:$0xff]  ;;  %v154_v53 = vld [vmem:[#allocation2 + $0x390] sm:$0xff]  ;;  %789 = vst [vmem:[#allocation7 + $0x368] sm:$0xff] %v661_v44  ;;  %v155_v58 = vld [vmem:[#allocation2 + $0x398] sm:$0xff] }
  0xa1   :  { %v663_v54 = vadd.f32 %v535_v46, %v407_v45  ;;  %v409_v55 = vmul.f32 0.91914505, %v153_v48  ;;  %v537_v56 = vmul.f32 0.3939193, %v281_v52  ;;  %v282_v57 = vld [vmem:[#allocation5 + $0x390] sm:$0xff]  ;;  %790 = vst [vmem:[#allocation7 + $0x370] sm:$0xff] %v662_v49 }
  0xa2   :  { %v664_v59 = vadd.f32 %v536_v51, %v408_v50  ;;  %v410_v60 = vmul.f32 0.91914505, %v154_v53  ;;  %v538_v61 = vmul.f32 0.3939193, %v282_v57  ;;  %v283_v62 = vld [vmem:[#allocation5 + $0x398] sm:$0xff]  ;;  %v156_v63 = vld [vmem:[#allocation2 + $0x3a0] sm:$0xff] }
  0xa3   :  { %791 = vst [vmem:[#allocation7 + $0x378] sm:$0xff] %v663_v54  ;;  %v665_v0 = vadd.f32 %v537_v56, %v409_v55  ;;  %v411_v1 = vmul.f32 0.91914505, %v155_v58  ;;  %v539_v2 = vmul.f32 0.3939193, %v283_v62  ;;  %v284_v3 = vld [vmem:[#allocation5 + $0x3a0] sm:$0xff] }
  0xa4   :  { %v157_v4 = vld [vmem:[#allocation2 + $0x3a8] sm:$0xff]  ;;  %792 = vst [vmem:[#allocation7 + $0x380] sm:$0xff] %v664_v59  ;;  %v666_v5 = vadd.f32 %v538_v61, %v410_v60  ;;  %v412_v6 = vmul.f32 0.91914505, %v156_v63  ;;  %v540_v7 = vmul.f32 0.3939193, %v284_v3 }
  0xa5   :  { %v285_v8 = vld [vmem:[#allocation5 + $0x3a8] sm:$0xff]  ;;  %v158_v9 = vld [vmem:[#allocation2 + $0x3b0] sm:$0xff]  ;;  %793 = vst [vmem:[#allocation7 + $0x388] sm:$0xff] %v665_v0  ;;  %v667_v10 = vadd.f32 %v539_v2, %v411_v1  ;;  %v413_v11 = vmul.f32 0.91914505, %v157_v4  ;;  %v159_v14 = vld [vmem:[#allocation2 + $0x3b8] sm:$0xff] }
  0xa6   :  { %v541_v12 = vmul.f32 0.3939193, %v285_v8  ;;  %v286_v13 = vld [vmem:[#allocation5 + $0x3b0] sm:$0xff]  ;;  %794 = vst [vmem:[#allocation7 + $0x390] sm:$0xff] %v666_v5  ;;  %v668_v15 = vadd.f32 %v540_v7, %v412_v6  ;;  %v414_v16 = vmul.f32 0.91914505, %v158_v9 }
  0xa7   :  { %v542_v17 = vmul.f32 0.3939193, %v286_v13  ;;  %v287_v18 = vld [vmem:[#allocation5 + $0x3b8] sm:$0xff]  ;;  %v160_v19 = vld [vmem:[#allocation2 + $0x3c0] sm:$0xff]  ;;  %795 = vst [vmem:[#allocation7 + $0x398] sm:$0xff] %v667_v10  ;;  %v161_v24 = vld [vmem:[#allocation2 + $0x3c8] sm:$0xff] }
  0xa8   :  { %v669_v20 = vadd.f32 %v541_v12, %v413_v11  ;;  %v415_v21 = vmul.f32 0.91914505, %v159_v14  ;;  %v543_v22 = vmul.f32 0.3939193, %v287_v18  ;;  %v288_v23 = vld [vmem:[#allocation5 + $0x3c0] sm:$0xff]  ;;  %796 = vst [vmem:[#allocation7 + $0x3a0] sm:$0xff] %v668_v15 }
  0xa9   :  { %v670_v25 = vadd.f32 %v542_v17, %v414_v16  ;;  %v416_v26 = vmul.f32 0.91914505, %v160_v19  ;;  %v544_v27 = vmul.f32 0.3939193, %v288_v23  ;;  %v289_v28 = vld [vmem:[#allocation5 + $0x3c8] sm:$0xff]  ;;  %v162_v29 = vld [vmem:[#allocation2 + $0x3d0] sm:$0xff] }
  0xaa   :  { %797 = vst [vmem:[#allocation7 + $0x3a8] sm:$0xff] %v669_v20  ;;  %v671_v30 = vadd.f32 %v543_v22, %v415_v21  ;;  %v417_v31 = vmul.f32 0.91914505, %v161_v24  ;;  %v545_v32 = vmul.f32 0.3939193, %v289_v28  ;;  %v290_v33 = vld [vmem:[#allocation5 + $0x3d0] sm:$0xff] }
  0xab   :  { %v163_v34 = vld [vmem:[#allocation2 + $0x3d8] sm:$0xff]  ;;  %798 = vst [vmem:[#allocation7 + $0x3b0] sm:$0xff] %v670_v25  ;;  %v672_v35 = vadd.f32 %v544_v27, %v416_v26  ;;  %v418_v36 = vmul.f32 0.91914505, %v162_v29  ;;  %v546_v37 = vmul.f32 0.3939193, %v290_v33 }
  0xac   :  { %v291_v38 = vld [vmem:[#allocation5 + $0x3d8] sm:$0xff]  ;;  %v164_v39 = vld [vmem:[#allocation2 + $0x3e0] sm:$0xff]  ;;  %799 = vst [vmem:[#allocation7 + $0x3b8] sm:$0xff] %v671_v30  ;;  %v673_v40 = vadd.f32 %v545_v32, %v417_v31  ;;  %v419_v41 = vmul.f32 0.91914505, %v163_v34  ;;  %v165_v44 = vld [vmem:[#allocation2 + $0x3e8] sm:$0xff] }
  0xad   :  { %v547_v42 = vmul.f32 0.3939193, %v291_v38  ;;  %v292_v43 = vld [vmem:[#allocation5 + $0x3e0] sm:$0xff]  ;;  %800 = vst [vmem:[#allocation7 + $0x3c0] sm:$0xff] %v672_v35  ;;  %v674_v45 = vadd.f32 %v546_v37, %v418_v36  ;;  %v420_v46 = vmul.f32 0.91914505, %v164_v39 }
  0xae   :  { %v548_v47 = vmul.f32 0.3939193, %v292_v43  ;;  %v293_v48 = vld [vmem:[#allocation5 + $0x3e8] sm:$0xff]  ;;  %v166_v49 = vld [vmem:[#allocation2 + $0x3f0] sm:$0xff]  ;;  %801 = vst [vmem:[#allocation7 + $0x3c8] sm:$0xff] %v673_v40  ;;  %v167_v54 = vld [vmem:[#allocation2 + $0x3f8] sm:$0xff] }
  0xaf   :  { %v675_v50 = vadd.f32 %v547_v42, %v419_v41  ;;  %v421_v51 = vmul.f32 0.91914505, %v165_v44  ;;  %v549_v52 = vmul.f32 0.3939193, %v293_v48  ;;  %v294_v53 = vld [vmem:[#allocation5 + $0x3f0] sm:$0xff]  ;;  %802 = vst [vmem:[#allocation7 + $0x3d0] sm:$0xff] %v674_v45 }
  0xb0   :  { %v676_v55 = vadd.f32 %v548_v47, %v420_v46  ;;  %v422_v56 = vmul.f32 0.91914505, %v166_v49  ;;  %v550_v57 = vmul.f32 0.3939193, %v294_v53  ;;  %v295_v58 = vld [vmem:[#allocation5 + $0x3f8] sm:$0xff] }
  0xb1   :  { %803 = vst [vmem:[#allocation7 + $0x3d8] sm:$0xff] %v675_v50  ;;  %v677_v59 = vadd.f32 %v549_v52, %v421_v51  ;;  %v423_v60 = vmul.f32 0.91914505, %v167_v54  ;;  %v551_v61 = vmul.f32 0.3939193, %v295_v58 }
  0xb2   :  { %804 = vst [vmem:[#allocation7 + $0x3e0] sm:$0xff] %v676_v55  ;;  %v678_v62 = vadd.f32 %v550_v57, %v422_v56 }
  0xb3   :  { %805 = vst [vmem:[#allocation7 + $0x3e8] sm:$0xff] %v677_v59  ;;  %v679_v63 = vadd.f32 %v551_v61, %v423_v60 }
  0xb4   :  { %806 = vst [vmem:[#allocation7 + $0x3f0] sm:$0xff] %v678_v62 }
  0xb5   :  { %807 = vst [vmem:[#allocation7 + $0x3f8] sm:$0xff] %v679_v63 }
  0xb6   :  { %882 = shalt.err (!%p879_p0)
}
  0xb7   :  { %819 = dma.vmem_to_hbm [thread:$0]  %s814_s1, 16384, %s937_s2, [#allocation4], %s898_s12, %s898_s12, %s899_s13  }
  0xb8   :  { %895 = dma.done.wait [#allocation4], 16384  }
  0xb9   :  { %896 = vsyncadd [#allocation4], 4294950912 }
  0xba   :  { %823 = vsyncpa [#allocation3], 1 }
  0xbb   :  { %824 = vsyncpa [#allocation6], 1 }
  0xbc   :  { %825 = vsyncpa [#allocation4], 1 }

</bundles_post_ra>
